<compile_context>
chip_gen: v7x
topology: tpu7x:2x2x1
jax: 0.10.0
libtpu: 0.0.40
codegen_flags: <defaults>
</compile_context>

<pallas_src>
import functools

import jax
import jax.numpy as jnp
from jax.experimental import pallas as pl
from jax.experimental.pallas import tpu as pltpu


# --------------------------------------------------------------------------- #
# Kernel
# --------------------------------------------------------------------------- #
def _drl_mlp_kernel(xin_ref, w1_ref, b1_ref, w2_ref, b2_ref, w3_ref, b3_ref,
                    o_ref, *, act_bf16):
    """Fused 3-layer MLP on one (tb, Kp) batch tile.

    xin already contains [sf is folded into W1] the x columns and t in col D;
    W1/W3/b3 already carry the scaling factors. So:  o = xin @ W1' ... + b3'.
    """
    # Layer 1 (MXU, bf16 x bf16 -> f32 accumulate). Bias add in f32.
    h = jnp.dot(xin_ref[...], w1_ref[...], preferred_element_type=jnp.float32)
    h = h + b1_ref[...]
    h = jnp.tanh(h.astype(jnp.bfloat16)) if act_bf16 \
        else jnp.tanh(h).astype(jnp.bfloat16)

    # Layer 2.
    h = jnp.dot(h, w2_ref[...], preferred_element_type=jnp.float32)
    h = h + b2_ref[...]
    h = jnp.tanh(h.astype(jnp.bfloat16)) if act_bf16 \
        else jnp.tanh(h).astype(jnp.bfloat16)

    # Layer 3 (outer sf already folded into w3/b3). Full-width unmasked store.
    out = jnp.dot(h, w3_ref[...], preferred_element_type=jnp.float32)
    o_ref[...] = (out + b3_ref[...]).astype(o_ref.dtype)


# --------------------------------------------------------------------------- #
# Host-side helpers
# --------------------------------------------------------------------------- #
def _round_up(n, m):
    return ((n + m - 1) // m) * m


def _pad2(a, rows, cols, dtype):
    a = jnp.asarray(a, jnp.float32)
    return jnp.pad(a, ((0, rows - a.shape[0]), (0, cols - a.shape[1]))).astype(dtype)


def _device_kind():
    try:
        return jax.devices()[0].device_kind.lower()
    except Exception:  # pragma: no cover
        return ""


def _num_tensorcores():
    kind = _device_kind()
    # v7x has 2 TensorCores per chip; v5e/v6e have 1.
    return 2 if ("v7" in kind or "7x" in kind) else 1


def _use_bf16_activations():
    # v5e has no bf16 VPU/EUP; keep f32 activations there.
    return "v5" not in _device_kind()


def _pick_tb(batch, num_tc, cap=1024):
    """Batch tile: 1 grid step on single-TC chips, 2 balanced steps on v7x."""
    if num_tc >= 2:
        per_core = -(-batch // 2)
    else:
        per_core = batch
    return min(_round_up(max(per_core, 8), 8), cap)


def prepare_drl_params(params, scaling_factor=1.0):
    """One-time prep: pad to lane-dense shapes, fold sf and the t-row into the
    matmul weights, cast matmul operands to bf16. Run once per model."""
    f32, bf16 = jnp.float32, jnp.bfloat16
    sf = jnp.float32(scaling_factor)
    D, H = params["w1x"].shape
    Dp = _round_up(D, 128)
    Hp = _round_up(H, 128)
    Kp = _round_up(D + 1, 128)          # input columns: [x (scaled via W1) | t]

    # W1' rows 0..D-1 = sf * W1x (input scaling net(t, sf*x)); row D = W1t.
    w1 = jnp.concatenate([sf * jnp.asarray(params["w1x"], f32),
                          jnp.asarray(params["w1t"], f32)], axis=0)
    w1 = jnp.pad(w1, ((0, Kp - (D + 1)), (0, Hp - H))).astype(bf16)

    b1 = _pad2(params["b1"], 1, Hp, f32)
    w2 = _pad2(params["w2"], Hp, Hp, bf16)
    b2 = _pad2(params["b2"], 1, Hp, f32)
    # Outer scaling_factor folded into the last layer.
    w3 = _pad2(sf * jnp.asarray(params["w3"], f32), Hp, Dp, bf16)
    b3 = _pad2(sf * jnp.asarray(params["b3"], f32), 1, Dp, f32)
    return (w1, b1, w2, b2, w3, b3)


# --------------------------------------------------------------------------- #
# Per-call jitted wrapper
# --------------------------------------------------------------------------- #
@functools.partial(jax.jit, static_argnames=("tb", "act_bf16"))
def _drl_forward(t, x, w1, b1, w2, b2, w3, b3, *, tb, act_bf16):
    B, D = x.shape
    Kp, Hp = w1.shape
    Dp = w3.shape[1]
    Bp = _round_up(B, tb)

    # Only the per-call activations are padded here (weights were prepped once).
    xin = jnp.concatenate([x, t], axis=1).astype(jnp.bfloat16)   # [B, D+1]
    xin = jnp.pad(xin, ((0, Bp - B), (0, Kp - (D + 1))))          # [Bp, Kp]

    grid = (Bp // tb,)
    batched = lambda shape: pl.BlockSpec(shape, lambda i: (i, 0))
    resident = lambda shape: pl.BlockSpec(shape, lambda i: (0, 0))

    flops = 2 * Bp * (Kp * Hp + Hp * Hp + Hp * Dp)
    bytes_accessed = (xin.size * 2 + Bp * Dp * 4
                      + (w1.size + w2.size + w3.size) * 2
                      + (b1.size + b2.size + b3.size) * 4)

    out_p = pl.pallas_call(
        functools.partial(_drl_mlp_kernel, act_bf16=act_bf16),
        out_shape=jax.ShapeDtypeStruct((Bp, Dp), jnp.float32),
        grid=grid,
        in_specs=[
            batched((tb, Kp)),        # [x | t] batch tile
            resident((Kp, Hp)),       # W1'  (VMEM-resident across grid steps)
            resident((1, Hp)),        # b1
            resident((Hp, Hp)),       # W2
            resident((1, Hp)),        # b2
            resident((Hp, Dp)),       # W3'
            resident((1, Dp)),        # b3'
        ],
        out_specs=batched((tb, Dp)),
        compiler_params=pltpu.CompilerParams(
            dimension_semantics=("parallel",)),
        cost_estimate=pl.CostEstimate(
            flops=flops,
            transcendentals=2 * Bp * Hp,
            bytes_accessed=bytes_accessed),
    )(xin, w1, b1, w2, b2, w3, b3)

    return out_p[:B, :D]


class DRLWrapperPallas:
    """Pallas-backed DRLWrapper.forward: sf * net(t, sf * x).

    scaling_factor is folded into the weights at construction time; if it
    changes, rebuild the wrapper (it is a fixed module attribute in the spec).
    """

    def __init__(self, params, scaling_factor=1.0, *, tb_cap=1024):
        self.prepped = prepare_drl_params(params, scaling_factor)
        self.num_tc = _num_tensorcores()
        self.act_bf16 = _use_bf16_activations()
        self.tb_cap = tb_cap

    def __call__(self, t, x):
        tb = _pick_tb(x.shape[0], self.num_tc, self.tb_cap)
        return _drl_forward(t, x, *self.prepped,
                            tb=tb, act_bf16=self.act_bf16)


# --------------------------------------------------------------------------- #
# References
# --------------------------------------------------------------------------- #
def _reference_forward_mirror(t, x, params, sf, act_bf16):
    """Pure-JAX reference mirroring the kernel numerics exactly."""
    bf16, f32 = jnp.bfloat16, jnp.float32
    w1 = jnp.concatenate([sf * params["w1x"], params["w1t"]], axis=0).astype(bf16)
    xin = jnp.concatenate([x, t], axis=1).astype(bf16)
    h = jnp.dot(xin, w1, preferred_element_type=f32) + params["b1"]
    h = jnp.tanh(h.astype(bf16)) if act_bf16 else jnp.tanh(h).astype(bf16)
    h = jnp.dot(h, params["w2"].astype(bf16), preferred_element_type=f32) + params["b2"]
    h = jnp.tanh(h.astype(bf16)) if act_bf16 else jnp.tanh(h).astype(bf16)
    out = jnp.dot(h, (sf * params["w3"]).astype(bf16), preferred_element_type=f32)
    return out + sf * params["b3"]


def _reference_forward_f32(t, x, params, sf):
    """Full-precision semantic reference of DRLWrapper.forward."""
    sx = sf * x
    h = jnp.tanh(sx @ params["w1x"] + t @ params["w1t"] + params["b1"])
    h = jnp.tanh(h @ params["w2"] + params["b2"])
    out = h @ params["w3"] + params["b3"]
    return sf * out


def _init_params(key, d, h):
    ks = jax.random.split(key, 4)
    scale = lambda fan_in: 1.0 / jnp.sqrt(jnp.float32(fan_in))
    return {
        "w1x": jax.random.normal(ks[0], (d, h), jnp.float32) * scale(d + 1),
        "w1t": jax.random.normal(ks[1], (1, h), jnp.float32) * scale(d + 1),
        "b1": jnp.zeros((1, h), jnp.float32),
        "w2": jax.random.normal(ks[2], (h, h), jnp.float32) * scale(h),
        "b2": jnp.zeros((1, h), jnp.float32),
        "w3": jax.random.normal(ks[3], (h, d), jnp.float32) * scale(h),
        "b3": jnp.zeros((1, d), jnp.float32),
    }


# TODO(synk): unnorm_log_prob_and_grad / unnorm_log_prob / energy delegate to
# the wrapped EBM and are not part of forward(); they are not implemented here.

if __name__ == "__main__":
    # Batched call (as the sampler would issue): many samples per pallas_call.
    B, D, H = 256, 32, 64
    key = jax.random.PRNGKey(0)
    k_t, k_x, k_p = jax.random.split(key, 3)

    t = jax.random.uniform(k_t, (B, 1), jnp.float32)
    x = jax.random.normal(k_x, (B, D), jnp.float32)
    params = _init_params(k_p, D, H)
    scaling_factor = 1.7

    model = DRLWrapperPallas(params, scaling_factor)
    out = model(t, x)
    out = jax.block_until_ready(out)
    assert out.shape == (B, D)

    # Bit-level-ish check against a reference with identical numerics.
    ref_mirror = _reference_forward_mirror(
        t, x, params, jnp.float32(scaling_factor), model.act_bf16)
    assert jnp.allclose(out, ref_mirror, atol=5e-3, rtol=5e-3), \
        "mismatch vs numerics-mirrored reference"

    # Semantic check against the full-f32 DRLWrapper reference.
    ref_f32 = _reference_forward_f32(t, x, params, jnp.float32(scaling_factor))
    assert jnp.allclose(out, ref_f32, atol=4e-2, rtol=4e-2), \
        "mismatch vs f32 reference"

    print("KERNEL_OK")
</pallas_src>

<mosaic_0001>
module attributes {stable_mosaic.version = 11 : i64} {
  func.func @_drl_mlp_kernel(%arg0: i32, %arg1: memref<256x128xbf16, #tpu.memory_space<vmem>>, %arg2: memref<128x128xbf16, #tpu.memory_space<vmem>>, %arg3: memref<1x128xf32, #tpu.memory_space<vmem>>, %arg4: memref<128x128xbf16, #tpu.memory_space<vmem>>, %arg5: memref<1x128xf32, #tpu.memory_space<vmem>>, %arg6: memref<128x128xbf16, #tpu.memory_space<vmem>>, %arg7: memref<1x128xf32, #tpu.memory_space<vmem>>, %arg8: memref<256x128xf32, #tpu.memory_space<vmem>>) attributes {dimension_semantics = [#tpu.dimension_semantics<parallel>], iteration_bounds = array<i64: 1>, scalar_prefetch = 0 : i64, scratch_operands = 0 : i64, tpu.core_type = #tpu.core_type<tc>, window_params = [{transform_indices = @transform_0, window_bounds = array<i64: 256, 128>}, {pipeline_mode = #tpu.pipeline_mode<synchronous>, transform_indices = @transform_1, window_bounds = array<i64: 128, 128>}, {pipeline_mode = #tpu.pipeline_mode<synchronous>, transform_indices = @transform_2, window_bounds = array<i64: 1, 128>}, {pipeline_mode = #tpu.pipeline_mode<synchronous>, transform_indices = @transform_3, window_bounds = array<i64: 128, 128>}, {pipeline_mode = #tpu.pipeline_mode<synchronous>, transform_indices = @transform_4, window_bounds = array<i64: 1, 128>}, {pipeline_mode = #tpu.pipeline_mode<synchronous>, transform_indices = @transform_5, window_bounds = array<i64: 128, 128>}, {pipeline_mode = #tpu.pipeline_mode<synchronous>, transform_indices = @transform_6, window_bounds = array<i64: 1, 128>}, {transform_indices = @transform_7, window_bounds = array<i64: 256, 128>}]} {
    %c0 = arith.constant 0 : index
    %c0_0 = arith.constant 0 : index
    %0 = vector.load %arg1[%c0, %c0_0] : memref<256x128xbf16, #tpu.memory_space<vmem>>, vector<256x128xbf16>
    %c0_1 = arith.constant 0 : index
    %c0_2 = arith.constant 0 : index
    %1 = vector.load %arg2[%c0_1, %c0_2] : memref<128x128xbf16, #tpu.memory_space<vmem>>, vector<128x128xbf16>
    %cst = arith.constant dense<0.000000e+00> : vector<256x128xf32>
    %2 = tpu.matmul %0, %1, %cst {dimension_numbers = #tpu.dot_dimension_numbers<[1], [0], [0], [1], [0, 0, 1, 1], [], []>} : vector<256x128xbf16>, vector<128x128xbf16>, vector<256x128xf32> -> vector<256x128xf32>
    %c0_3 = arith.constant 0 : index
    %c0_4 = arith.constant 0 : index
    %3 = vector.load %arg3[%c0_3, %c0_4] : memref<1x128xf32, #tpu.memory_space<vmem>>, vector<1x128xf32>
    %4 = vector.broadcast %3 : vector<1x128xf32> to vector<256x128xf32>
    %5 = arith.addf %2, %4 : vector<256x128xf32>
    %6 = arith.truncf %5 : vector<256x128xf32> to vector<256x128xbf16>
    %7 = math.tanh %6 : vector<256x128xbf16>
    %c0_5 = arith.constant 0 : index
    %c0_6 = arith.constant 0 : index
    %8 = vector.load %arg4[%c0_5, %c0_6] : memref<128x128xbf16, #tpu.memory_space<vmem>>, vector<128x128xbf16>
    %cst_7 = arith.constant dense<0.000000e+00> : vector<256x128xf32>
    %9 = tpu.matmul %7, %8, %cst_7 {dimension_numbers = #tpu.dot_dimension_numbers<[1], [0], [0], [1], [0, 0, 1, 1], [], []>} : vector<256x128xbf16>, vector<128x128xbf16>, vector<256x128xf32> -> vector<256x128xf32>
    %c0_8 = arith.constant 0 : index
    %c0_9 = arith.constant 0 : index
    %10 = vector.load %arg5[%c0_8, %c0_9] : memref<1x128xf32, #tpu.memory_space<vmem>>, vector<1x128xf32>
    %11 = vector.broadcast %10 : vector<1x128xf32> to vector<256x128xf32>
    %12 = arith.addf %9, %11 : vector<256x128xf32>
    %13 = arith.truncf %12 : vector<256x128xf32> to vector<256x128xbf16>
    %14 = math.tanh %13 : vector<256x128xbf16>
    %c0_10 = arith.constant 0 : index
    %c0_11 = arith.constant 0 : index
    %15 = vector.load %arg6[%c0_10, %c0_11] : memref<128x128xbf16, #tpu.memory_space<vmem>>, vector<128x128xbf16>
    %cst_12 = arith.constant dense<0.000000e+00> : vector<256x128xf32>
    %16 = tpu.matmul %14, %15, %cst_12 {dimension_numbers = #tpu.dot_dimension_numbers<[1], [0], [0], [1], [0, 0, 1, 1], [], []>} : vector<256x128xbf16>, vector<128x128xbf16>, vector<256x128xf32> -> vector<256x128xf32>
    %c0_13 = arith.constant 0 : index
    %c0_14 = arith.constant 0 : index
    %17 = vector.load %arg7[%c0_13, %c0_14] : memref<1x128xf32, #tpu.memory_space<vmem>>, vector<1x128xf32>
    %18 = vector.broadcast %17 : vector<1x128xf32> to vector<256x128xf32>
    %19 = arith.addf %16, %18 : vector<256x128xf32>
    %c0_15 = arith.constant 0 : index
    %c0_16 = arith.constant 0 : index
    %20 = vector.load %arg8[%c0_15, %c0_16] : memref<256x128xf32, #tpu.memory_space<vmem>>, vector<256x128xf32>
    tpu.vector_store %arg8[%c0_15, %c0_16], %19 {strides = array<i32>} : memref<256x128xf32, #tpu.memory_space<vmem>>, vector<256x128xf32>,
    return
  }
  func.func @transform_0(%arg0: i32) -> (i32, i32) {
    %c0_i32 = arith.constant 0 : i32
    %c0_i32_0 = arith.constant 0 : i32
    return %arg0, %c0_i32 : i32, i32
  }
  func.func @transform_1(%arg0: i32) -> (i32, i32) {
    %c0_i32 = arith.constant 0 : i32
    %c0_i32_0 = arith.constant 0 : i32
    %c0_i32_1 = arith.constant 0 : i32
    return %c0_i32, %c0_i32_0 : i32, i32
  }
  func.func @transform_2(%arg0: i32) -> (i32, i32) {
    %c0_i32 = arith.constant 0 : i32
    %c0_i32_0 = arith.constant 0 : i32
    %c0_i32_1 = arith.constant 0 : i32
    return %c0_i32, %c0_i32_0 : i32, i32
  }
  func.func @transform_3(%arg0: i32) -> (i32, i32) {
    %c0_i32 = arith.constant 0 : i32
    %c0_i32_0 = arith.constant 0 : i32
    %c0_i32_1 = arith.constant 0 : i32
    return %c0_i32, %c0_i32_0 : i32, i32
  }
  func.func @transform_4(%arg0: i32) -> (i32, i32) {
    %c0_i32 = arith.constant 0 : i32
    %c0_i32_0 = arith.constant 0 : i32
    %c0_i32_1 = arith.constant 0 : i32
    return %c0_i32, %c0_i32_0 : i32, i32
  }
  func.func @transform_5(%arg0: i32) -> (i32, i32) {
    %c0_i32 = arith.constant 0 : i32
    %c0_i32_0 = arith.constant 0 : i32
    %c0_i32_1 = arith.constant 0 : i32
    return %c0_i32, %c0_i32_0 : i32, i32
  }
  func.func @transform_6(%arg0: i32) -> (i32, i32) {
    %c0_i32 = arith.constant 0 : i32
    %c0_i32_0 = arith.constant 0 : i32
    %c0_i32_1 = arith.constant 0 : i32
    return %c0_i32, %c0_i32_0 : i32, i32
  }
  func.func @transform_7(%arg0: i32) -> (i32, i32) {
    %c0_i32 = arith.constant 0 : i32
    %c0_i32_0 = arith.constant 0 : i32
    return %arg0, %c0_i32 : i32, i32
  }
}

</mosaic_0001>

<bundles_post_ra>
// kernel: _drl_forward.1
= control target key start
LH: loop header
LB: loop body
LE: loop exit
PB: predicated region body
PF: predicated region fallthrough
CT: control target
= control target key end

     0   :  { %s1733_s1 = inlined_call_operand.vmem [shape: bf16[128,128], index: 1, kind: input, shape index: {}]   ;;  %s1734_s0 = inlined_call_operand.vmem [shape: bf16[256,128], index: 0, kind: input, shape index: {}]   ;;  %s1735_s3 = inlined_call_operand.vmem [shape: bf16[128,128], index: 3, kind: input, shape index: {}]   ;;  %s1736_s5 = inlined_call_operand.vmem [shape: bf16[128,128], index: 5, kind: input, shape index: {}]   ;;  %s1737_s2 = inlined_call_operand.vmem [shape: f32[1,128], index: 2, kind: input, shape index: {}]   ;;  %s1738_s4 = inlined_call_operand.vmem [shape: f32[1,128], index: 4, kind: input, shape index: {}]   ;;  %s1739_s6 = inlined_call_operand.vmem [shape: f32[1,128], index: 6, kind: input, shape index: {}]   ;;  %s1740_s7 = inlined_call_operand.vmem [shape: f32[256,128], index: 7, kind: output, shape index: {}]  }
   0x1   :  { %v1226_v0 = vld [vmem:[%s1733_s1] sm:$0xff]   ;;  %v1227_v1 = vld [vmem:[%s1733_s1 + $0x8] sm:$0xff]   ;;  %v1228_v2 = vld [vmem:[%s1733_s1 + $0x10] sm:$0xff]  }
   0x2   :  { %1066 = vmatprep.subr.bf16.mxu0 %v1226_v0  ;;  %1210 = vmatprep.subr.bf16.mxu1 %v1226_v0  ;;  %v1229_v3 = vld [vmem:[%s1733_s1 + $0x18] sm:$0xff]   ;;  %v1234_v4 = vld [vmem:[%s1734_s0] sm:$0xff]   ;;  %v1231_v6 = vld [vmem:[%s1733_s1 + $0x28] sm:$0xff]  }
   0x3   :  { %1067 = vmatpush3.bf16.msra.mxu0 %v1226_v0  ;;  %1218 = vmatpush3.bf16.msra.mxu1 %v1226_v0  ;;  %v1230_v5 = vld [vmem:[%s1733_s1 + $0x20] sm:$0xff]   ;;  %v1232_v8 = vld [vmem:[%s1733_s1 + $0x30] sm:$0xff]   ;;  %v1233_v9 = vld [vmem:[%s1733_s1 + $0x38] sm:$0xff]  }
   0x4   :  { %1068 = vmatprep.subr.bf16.mxu0 %v1227_v1  ;;  %1211 = vmatprep.subr.bf16.mxu1 %v1227_v1  ;;  %v1242_v7 = vld [vmem:[%s1734_s0 + $0x40] sm:$0xff]   ;;  %v1235_v11 = vld [vmem:[%s1734_s0 + $0x8] sm:$0xff]   ;;  %v1236_v13 = vld [vmem:[%s1734_s0 + $0x10] sm:$0xff]  }
   0x5   :  { %1082 = vmatprep.mubr.bf16.mxu0 %v1234_v4  ;;  %1098 = vmatprep.mubr.bf16.mxu1 %v1242_v7  ;;  %v1250_v10 = vld [vmem:[%s1735_s3] sm:$0xff]   ;;  %v1243_v12 = vld [vmem:[%s1734_s0 + $0x48] sm:$0xff]   ;;  %v1244_v14 = vld [vmem:[%s1734_s0 + $0x50] sm:$0xff]  }
   0x6   :  { %v1251_v15 = vld [vmem:[%s1735_s3 + $0x8] sm:$0xff]   ;;  %v1252_v16 = vld [vmem:[%s1735_s3 + $0x10] sm:$0xff]   ;;  %v1237_v17 = vld [vmem:[%s1734_s0 + $0x18] sm:$0xff]  }
   0x7   :  { %1069 = vmatpush3.bf16.msra.mxu0 %v1227_v1  ;;  %1219 = vmatpush3.bf16.msra.mxu1 %v1227_v1  ;;  %v1245_v18 = vld [vmem:[%s1734_s0 + $0x58] sm:$0xff]   ;;  %v1238_v19 = vld [vmem:[%s1734_s0 + $0x20] sm:$0xff]   ;;  %v1239_v21 = vld [vmem:[%s1734_s0 + $0x28] sm:$0xff]  }
   0x8   :  { %1070 = vmatprep.subr.bf16.mxu0 %v1228_v2  ;;  %1212 = vmatprep.subr.bf16.mxu1 %v1228_v2  ;;  %v1246_v20 = vld [vmem:[%s1734_s0 + $0x60] sm:$0xff]   ;;  %v1247_v22 = vld [vmem:[%s1734_s0 + $0x68] sm:$0xff]   ;;  %v1240_v23 = vld [vmem:[%s1734_s0 + $0x30] sm:$0xff]  }
   0x9   :  { %v1248_v24 = vld [vmem:[%s1734_s0 + $0x70] sm:$0xff]   ;;  %v1241_v25 = vld [vmem:[%s1734_s0 + $0x38] sm:$0xff]   ;;  %v1254_v28 = vld [vmem:[%s1735_s3 + $0x20] sm:$0xff]  }
   0xa   :  { %v1249_v26 = vld [vmem:[%s1734_s0 + $0x78] sm:$0xff]   ;;  %v1255_v29 = vld [vmem:[%s1735_s3 + $0x28] sm:$0xff]   ;;  %v1256_v30 = vld [vmem:[%s1735_s3 + $0x30] sm:$0xff]  }
   0xb   :  { %1071 = vmatpush3.bf16.msra.mxu0 %v1228_v2  ;;  %1220 = vmatpush3.bf16.msra.mxu1 %v1228_v2  ;;  %v1253_v27 = vld [vmem:[%s1735_s3 + $0x18] sm:$0xff]   ;;  %v1258_v32 = vld [vmem:[%s1736_s5] sm:$0xff]   ;;  %v1259_v33 = vld [vmem:[%s1736_s5 + $0x8] sm:$0xff]  }
   0xc   :  { %1072 = vmatprep.subr.bf16.mxu0 %v1229_v3  ;;  %1213 = vmatprep.subr.bf16.mxu1 %v1229_v3  ;;  %v1257_v31 = vld [vmem:[%s1735_s3 + $0x38] sm:$0xff]   ;;  %v1260_v34 = vld [vmem:[%s1736_s5 + $0x10] sm:$0xff]   ;;  %v1478_v36 = vld [vmem:[%s1737_s2] ss:$0 sm:$0xff] }
   0xf   :  { %1073 = vmatpush3.bf16.msra.mxu0 %v1229_v3  ;;  %1221 = vmatpush3.bf16.msra.mxu1 %v1229_v3 }
  0x10   :  { %1074 = vmatprep.subr.bf16.mxu0 %v1230_v5  ;;  %1214 = vmatprep.subr.bf16.mxu1 %v1230_v5 }
  0x13   :  { %1075 = vmatpush3.bf16.msra.mxu0 %v1230_v5  ;;  %1222 = vmatpush3.bf16.msra.mxu1 %v1230_v5 }
  0x14   :  { %1076 = vmatprep.subr.bf16.mxu0 %v1231_v6  ;;  %1215 = vmatprep.subr.bf16.mxu1 %v1231_v6 }
  0x17   :  { %1077 = vmatpush3.bf16.msra.mxu0 %v1231_v6  ;;  %1223 = vmatpush3.bf16.msra.mxu1 %v1231_v6 }
  0x18   :  { %1078 = vmatprep.subr.bf16.mxu0 %v1232_v8  ;;  %1216 = vmatprep.subr.bf16.mxu1 %v1232_v8 }
  0x1b   :  { %1079 = vmatpush3.bf16.msra.mxu0 %v1232_v8  ;;  %1224 = vmatpush3.bf16.msra.mxu1 %v1232_v8 }
  0x1c   :  { %1080 = vmatprep.subr.bf16.mxu0 %v1233_v9  ;;  %1217 = vmatprep.subr.bf16.mxu1 %v1233_v9 }
  0x1f   :  { %1081 = vmatpush3.bf16.msra.mxu0 %v1233_v9  ;;  %1225 = vmatpush3.bf16.msra.mxu1 %v1233_v9 }
  0x20   :  { %1114 = vmatprep.subr.bf16.mxu1 %v1250_v10  ;;  %1162 = vmatprep.subr.bf16.mxu0 %v1258_v32 }
  0x22   :  { %1083 = vmatmul.mubr.bf16.vlgmr.msra.gmra.mrb[0].mxu0 %v1235_v11  ;;  %1099 = vmatmul.mubr.bf16.vlgmr.msra.gmra.mrb[0].mxu1 %v1243_v12 }
  0x23   :  { %1086 = vmatprep.mubr.bf16.mxu0 %v1236_v13  ;;  %1102 = vmatprep.mubr.bf16.mxu1 %v1244_v14 }
  0x24   :  { %1115 = vmatpush3.bf16.msra.mxu1 %v1250_v10  ;;  %1163 = vmatpush3.bf16.msra.mxu0 %v1258_v32 }
  0x25   :  { %1116 = vmatprep.subr.bf16.mxu1 %v1251_v15  ;;  %1164 = vmatprep.subr.bf16.mxu0 %v1259_v33 }
  0x28   :  { %1117 = vmatpush3.bf16.msra.mxu1 %v1251_v15  ;;  %1165 = vmatpush3.bf16.msra.mxu0 %v1259_v33 }
  0x29   :  { %1118 = vmatprep.subr.bf16.mxu1 %v1252_v16  ;;  %1166 = vmatprep.subr.bf16.mxu0 %v1260_v34 }
  0x2a   :  { %1087 = vmatmul.mubr.bf16.gmra.mrb[4].mxu0 %v1237_v17  ;;  %1103 = vmatmul.mubr.bf16.gmra.mrb[4].mxu1 %v1245_v18 }
  0x2b   :  { %1090 = vmatprep.mubr.bf16.mxu0 %v1238_v19  ;;  %1106 = vmatprep.mubr.bf16.mxu1 %v1246_v20 }
  0x2c   :  { %1119 = vmatpush3.bf16.msra.mxu1 %v1252_v16  ;;  %1167 = vmatpush3.bf16.msra.mxu0 %v1260_v34 }
  0x2d   :  { %1120 = vmatprep.subr.bf16.mxu1 %v1253_v27 }
  0x30   :  { %1121 = vmatpush3.bf16.msra.mxu1 %v1253_v27 }
  0x31   :  { %1122 = vmatprep.subr.bf16.mxu1 %v1254_v28 }
  0x32   :  { %1091 = vmatmul.mubr.bf16.gmra.mrb[8].mxu0 %v1239_v21  ;;  %1107 = vmatmul.mubr.bf16.gmra.mrb[8].mxu1 %v1247_v22 }
  0x33   :  { %1094 = vmatprep.mubr.bf16.mxu0 %v1240_v23  ;;  %1110 = vmatprep.mubr.bf16.mxu1 %v1248_v24 }
  0x34   :  { %1123 = vmatpush3.bf16.msra.mxu1 %v1254_v28 }
  0x35   :  { %1124 = vmatprep.subr.bf16.mxu1 %v1255_v29 }
  0x38   :  { %1125 = vmatpush3.bf16.msra.mxu1 %v1255_v29 }
  0x39   :  { %1126 = vmatprep.subr.bf16.mxu1 %v1256_v30 }
  0x3a   :  { %1095 = vmatmul.mubr.bf16.gmra.mrb[12].mxu0 %v1241_v25  ;;  %1111 = vmatmul.mubr.bf16.gmra.mrb[12].mxu1 %v1249_v26 }
  0x3c   :  { %1127 = vmatpush3.bf16.msra.mxu1 %v1256_v30 }
  0x3d   :  { %1128 = vmatprep.subr.bf16.mxu1 %v1257_v31 }
  0x40   :  { %1129 = vmatpush3.bf16.msra.mxu1 %v1257_v31 }
  0xf5   :  { %v1084_v35 = vpop.f32.mrb[0].mxu0  ;;  %v1100_v37 = vpop.f32.mrb[0].mxu1 }
  0xf6   :  { %v260_v38 = vpop.f32.mrb[1].mxu0  ;;  %v1481_v39 = vadd.f32 %v1100_v37, %v1478_v36  ;;  %v324_v40 = vpop.f32.mrb[1].mxu1  ;;  %v269_v44 = vadd.f32 %v1084_v35, %v1478_v36 }
  0xf7   :  { %v1085_v41 = vpop.f32.mrb[2].mxu0  ;;  %v1484_v42 = vadd.f32 %v1478_v36, %v324_v40  ;;  %v1101_v43 = vpop.f32.mrb[2].mxu1  ;;  %v261_v49 = vadd.f32 %v1478_v36, %v260_v38 }
  0xf8   :  { %v272_v45 = vadd.f32 %v1085_v41, %v1478_v36  ;;  %v263_v46 = vpop.f32.mrb[3].mxu0  ;;  %v1489_v47 = vadd.f32 %v1101_v43, %v1478_v36  ;;  %v327_v48 = vpop.f32.mrb[3].mxu1 }
  0xf9   :  { %v264_v50 = vadd.f32 %v1478_v36, %v263_v46  ;;  %v1494_v51 = vadd.f32 %v1478_v36, %v327_v48 }
  0xfa   :  { %v388_v52 = vpack.c.bf16 %v272_v45, %v269_v44  ;;  %v396_v53 = vpack.c.bf16 %v1489_v47, %v1481_v39 }
  0xfb   :  { %v387_v54 = vpack.c.bf16 %v264_v50, %v261_v49  ;;  %v395_v55 = vpack.c.bf16 %v1494_v51, %v1484_v42 }
  0xfd   :  { %1266 = vtanh.bf16 %v387_v54  ;;  %v1088_v56 = vpop.f32.mrb[4].mxu0  ;;  %v1104_v57 = vpop.f32.mrb[4].mxu1 }
  0xfe   :  { %1268 = vtanh.bf16 %v388_v52  ;;  %v276_v58 = vpop.f32.mrb[5].mxu0  ;;  %v1501_v59 = vadd.f32 %v1104_v57, %v1478_v36  ;;  %v340_v60 = vpop.f32.mrb[5].mxu1  ;;  %v285_v0 = vadd.f32 %v1088_v56, %v1478_v36 }
  0xff   :  { %v1089_v61 = vpop.f32.mrb[6].mxu0  ;;  %v1504_v62 = vadd.f32 %v1478_v36, %v340_v60  ;;  %v1105_v63 = vpop.f32.mrb[6].mxu1  ;;  %v277_v5 = vadd.f32 %v1478_v36, %v276_v58 }
 0x100   :  { %v288_v1 = vadd.f32 %v1089_v61, %v1478_v36  ;;  %v279_v2 = vpop.f32.mrb[7].mxu0  ;;  %v1509_v3 = vadd.f32 %v1105_v63, %v1478_v36  ;;  %v343_v4 = vpop.f32.mrb[7].mxu1 }
 0x101   :  { %v280_v6 = vadd.f32 %v1478_v36, %v279_v2  ;;  %v1514_v7 = vadd.f32 %v1478_v36, %v343_v4 }
 0x102   :  { %v390_v8 = vpack.c.bf16 %v288_v1, %v285_v0  ;;  %v398_v9 = vpack.c.bf16 %v1509_v3, %v1501_v59  ;;  %v1261_v59 = vld [vmem:[%s1736_s5 + $0x18] sm:$0xff]   ;;  %v1262_v3 = vld [vmem:[%s1736_s5 + $0x20] sm:$0xff]  }
 0x103   :  { %v389_v10 = vpack.c.bf16 %v280_v6, %v277_v5  ;;  %v397_v11 = vpack.c.bf16 %v1514_v7, %v1504_v62  ;;  %1168 = vmatprep.subr.bf16.mxu0 %v1261_v59  ;;  %v1263_v6 = vld [vmem:[%s1736_s5 + $0x28] sm:$0xff]   ;;  %v1264_v7 = vld [vmem:[%s1736_s5 + $0x30] sm:$0xff]  }
 0x104   :  { %1169 = vmatpush3.bf16.msra.mxu0 %v1261_v59 }
 0x105   :  { %1270 = vtanh.bf16 %v389_v10  ;;  %v1092_v12 = vpop.f32.mrb[8].mxu0  ;;  %v1108_v13 = vpop.f32.mrb[8].mxu1  ;;  %1170 = vmatprep.subr.bf16.mxu0 %v1262_v3  ;;  %v1566_v10 = vld [vmem:[%s1738_s4] ss:$0 sm:$0xff] }
 0x106   :  { %1272 = vtanh.bf16 %v390_v8  ;;  %v292_v14 = vpop.f32.mrb[9].mxu0  ;;  %v1521_v15 = vadd.f32 %v1108_v13, %v1478_v36  ;;  %v356_v16 = vpop.f32.mrb[9].mxu1  ;;  %v301_v21 = vadd.f32 %v1092_v12, %v1478_v36  ;;  %v1265_v8 = vld [vmem:[%s1736_s5 + $0x38] sm:$0xff]  }
 0x107   :  { %v1093_v17 = vpop.f32.mrb[10].mxu0  ;;  %v357_v18 = vadd.f32 %v1478_v36, %v356_v16  ;;  %v1109_v19 = vpop.f32.mrb[10].mxu1  ;;  %v293_v27 = vadd.f32 %v1478_v36, %v292_v14 }
 0x108   :  { %v1267_v20 = vpop.eup %1266  ;;  %v304_v22 = vadd.f32 %v1093_v17, %v1478_v36  ;;  %v295_v23 = vpop.f32.mrb[11].mxu0  ;;  %v368_v24 = vadd.f32 %v1109_v19, %v1478_v36  ;;  %1171 = vmatpush3.bf16.msra.mxu0 %v1262_v3 }
 0x109   :  { %v359_v25 = vpop.f32.mrb[11].mxu1  ;;  %v1269_v26 = vpop.eup %1268  ;;  %v296_v28 = vadd.f32 %v1478_v36, %v295_v23  ;;  %1130 = vmatprep.mubr.bf16.mxu1 %v1267_v20  ;;  %1172 = vmatprep.subr.bf16.mxu0 %v1263_v6 }
 0x10a   :  { %v360_v29 = vadd.f32 %v1478_v36, %v359_v25  ;;  %v392_v30 = vpack.c.bf16 %v304_v22, %v301_v21  ;;  %1131 = vmatmul.mubr.bf16.vlgmr.msra.gmra.mrb[16].mxu1 %v1269_v26  ;;  %v400_v31 = vpack.c.bf16 %v368_v24, %v1521_v15 }
 0x10b   :  { %v391_v32 = vpack.c.bf16 %v296_v28, %v293_v27 }
 0x10c   :  { %v399_v33 = vpack.c.bf16 %v360_v29, %v357_v18  ;;  %1173 = vmatpush3.bf16.msra.mxu0 %v1263_v6 }
 0x10d   :  { %1274 = vtanh.bf16 %v391_v32  ;;  %v1096_v34 = vpop.f32.mrb[12].mxu0  ;;  %v1112_v35 = vpop.f32.mrb[12].mxu1  ;;  %1174 = vmatprep.subr.bf16.mxu0 %v1264_v7 }
 0x10e   :  { %1276 = vtanh.bf16 %v392_v30  ;;  %v308_v37 = vpop.f32.mrb[13].mxu0  ;;  %v381_v38 = vadd.f32 %v1112_v35, %v1478_v36  ;;  %v372_v40 = vpop.f32.mrb[13].mxu1  ;;  %v317_v46 = vadd.f32 %v1096_v34, %v1478_v36 }
 0x10f   :  { %v1097_v41 = vpop.f32.mrb[14].mxu0  ;;  %v373_v43 = vadd.f32 %v1478_v36, %v372_v40  ;;  %v1113_v44 = vpop.f32.mrb[14].mxu1  ;;  %v309_v56 = vadd.f32 %v1478_v36, %v308_v37  ;;  %1278 = vtanh.bf16 %v395_v55 }
 0x110   :  { %v1271_v45 = vpop.eup %1270  ;;  %v320_v48 = vadd.f32 %v1097_v41, %v1478_v36  ;;  %v311_v49 = vpop.f32.mrb[15].mxu0  ;;  %v384_v50 = vadd.f32 %v1113_v44, %v1478_v36  ;;  %1175 = vmatpush3.bf16.msra.mxu0 %v1264_v7 }
 0x111   :  { %v375_v52 = vpop.f32.mrb[15].mxu1  ;;  %v1273_v54 = vpop.eup %1272  ;;  %v312_v57 = vadd.f32 %v1478_v36, %v311_v49  ;;  %1134 = vmatprep.mubr.bf16.mxu1 %v1271_v45  ;;  %1176 = vmatprep.subr.bf16.mxu0 %v1265_v8 }
 0x112   :  { %v376_v58 = vadd.f32 %v1478_v36, %v375_v52  ;;  %v394_v60 = vpack.c.bf16 %v320_v48, %v317_v46  ;;  %1135 = vmatmul.mubr.bf16.gmra.mrb[20].mxu1 %v1273_v54  ;;  %v402_v61 = vpack.c.bf16 %v384_v50, %v381_v38 }
 0x113   :  { %v393_v62 = vpack.c.bf16 %v312_v57, %v309_v56 }
 0x114   :  { %v401_v63 = vpack.c.bf16 %v376_v58, %v373_v43  ;;  %1177 = vmatpush3.bf16.msra.mxu0 %v1265_v8 }
 0x115   :  { %1280 = vtanh.bf16 %v393_v62 }
 0x116   :  { %1282 = vtanh.bf16 %v394_v60 }
 0x117   :  { %1284 = vtanh.bf16 %v397_v11 }
 0x118   :  { %v1275_v0 = vpop.eup %1274  ;;  %1286 = vtanh.bf16 %v396_v53 }
 0x119   :  { %v1277_v1 = vpop.eup %1276  ;;  %1138 = vmatprep.mubr.bf16.mxu1 %v1275_v0  ;;  %1288 = vtanh.bf16 %v399_v33 }
 0x11a   :  { %1139 = vmatmul.mubr.bf16.gmra.mrb[24].mxu1 %v1277_v1  ;;  %v1279_v36 = vpop.eup %1278  ;;  %1290 = vtanh.bf16 %v398_v9 }
 0x11b   :  { %1292 = vtanh.bf16 %v401_v63 }
 0x11c   :  { %1294 = vtanh.bf16 %v400_v31 }
 0x11d   :  { %1296 = vtanh.bf16 %v402_v61 }
 0x120   :  { %v1281_v2 = vpop.eup %1280 }
 0x121   :  { %v1283_v4 = vpop.eup %1282  ;;  %1142 = vmatprep.mubr.bf16.mxu1 %v1281_v2 }
 0x122   :  { %1143 = vmatmul.mubr.bf16.gmra.mrb[28].mxu1 %v1283_v4  ;;  %v1285_v42 = vpop.eup %1284 }
 0x123   :  { %1146 = vmatprep.mubr.bf16.mxu1 %v1279_v36  ;;  %v1287_v51 = vpop.eup %1286 }
 0x124   :  { %v1289_v55 = vpop.eup %1288 }
 0x125   :  { %v1291_v39 = vpop.eup %1290 }
 0x126   :  { %v1293_v47 = vpop.eup %1292 }
 0x127   :  { %v1295_v53 = vpop.eup %1294 }
 0x128   :  { %v1297_v5 = vpop.eup %1296 }
 0x12a   :  { %1147 = vmatmul.mubr.bf16.gmra.mrb[32].mxu1 %v1287_v51 }
 0x12b   :  { %1150 = vmatprep.mubr.bf16.mxu1 %v1285_v42 }
 0x132   :  { %1151 = vmatmul.mubr.bf16.gmra.mrb[36].mxu1 %v1291_v39 }
 0x133   :  { %1154 = vmatprep.mubr.bf16.mxu1 %v1289_v55 }
 0x13a   :  { %1155 = vmatmul.mubr.bf16.gmra.mrb[40].mxu1 %v1295_v53 }
 0x13b   :  { %1158 = vmatprep.mubr.bf16.mxu1 %v1293_v47 }
 0x142   :  { %1159 = vmatmul.mubr.bf16.gmra.mrb[44].mxu1 %v1297_v5 }
 0x1dd   :  { %v1132_v9 = vpop.f32.mrb[16].mxu1 }
 0x1de   :  { %v524_v11 = vpop.f32.mrb[17].mxu1  ;;  %v533_v13 = vadd.f32 %v1132_v9, %v1566_v10 }
 0x1df   :  { %v1133_v12 = vpop.f32.mrb[18].mxu1  ;;  %v525_v16 = vadd.f32 %v1566_v10, %v524_v11 }
 0x1e0   :  { %v536_v14 = vadd.f32 %v1133_v12, %v1566_v10  ;;  %v527_v15 = vpop.f32.mrb[19].mxu1 }
 0x1e1   :  { %v528_v17 = vadd.f32 %v1566_v10, %v527_v15 }
 0x1e2   :  { %v652_v18 = vpack.c.bf16 %v536_v14, %v533_v13 }
 0x1e3   :  { %v651_v19 = vpack.c.bf16 %v528_v17, %v525_v16 }
 0x1e5   :  { %1298 = vtanh.bf16 %v651_v19  ;;  %v1136_v20 = vpop.f32.mrb[20].mxu1 }
 0x1e6   :  { %1300 = vtanh.bf16 %v652_v18  ;;  %v540_v21 = vpop.f32.mrb[21].mxu1  ;;  %v549_v23 = vadd.f32 %v1136_v20, %v1566_v10 }
 0x1e7   :  { %v1137_v22 = vpop.f32.mrb[22].mxu1  ;;  %v541_v26 = vadd.f32 %v1566_v10, %v540_v21 }
 0x1e8   :  { %v552_v24 = vadd.f32 %v1137_v22, %v1566_v10  ;;  %v543_v25 = vpop.f32.mrb[23].mxu1 }
 0x1e9   :  { %v544_v27 = vadd.f32 %v1566_v10, %v543_v25 }
 0x1ea   :  { %v654_v28 = vpack.c.bf16 %v552_v24, %v549_v23 }
 0x1eb   :  { %v653_v29 = vpack.c.bf16 %v544_v27, %v541_v26 }
 0x1ed   :  { %1302 = vtanh.bf16 %v653_v29  ;;  %v1140_v30 = vpop.f32.mrb[24].mxu1 }
 0x1ee   :  { %1304 = vtanh.bf16 %v654_v28  ;;  %v556_v31 = vpop.f32.mrb[25].mxu1  ;;  %v565_v34 = vadd.f32 %v1140_v30, %v1566_v10 }
 0x1ef   :  { %v1141_v32 = vpop.f32.mrb[26].mxu1  ;;  %v557_v40 = vadd.f32 %v1566_v10, %v556_v31 }
 0x1f0   :  { %v1299_v33 = vpop.eup %1298  ;;  %v568_v35 = vadd.f32 %v1141_v32, %v1566_v10  ;;  %v559_v37 = vpop.f32.mrb[27].mxu1 }
 0x1f1   :  { %v1301_v38 = vpop.eup %1300  ;;  %v560_v41 = vadd.f32 %v1566_v10, %v559_v37  ;;  %1178 = vmatprep.mubr.bf16.mxu0 %v1299_v33 }
 0x1f2   :  { %v656_v43 = vpack.c.bf16 %v568_v35, %v565_v34  ;;  %1179 = vmatmul.mubr.bf16.vlgmr.msra.gmra.mrb[16].mxu0 %v1301_v38 }
 0x1f3   :  { %v655_v44 = vpack.c.bf16 %v560_v41, %v557_v40 }
 0x1f5   :  { %1306 = vtanh.bf16 %v655_v44  ;;  %v1144_v45 = vpop.f32.mrb[28].mxu1 }
 0x1f6   :  { %1308 = vtanh.bf16 %v656_v43  ;;  %v572_v46 = vpop.f32.mrb[29].mxu1  ;;  %v581_v50 = vadd.f32 %v1144_v45, %v1566_v10 }
 0x1f7   :  { %v1145_v48 = vpop.f32.mrb[30].mxu1  ;;  %v573_v57 = vadd.f32 %v1566_v10, %v572_v46  ;;  %v1603_v46 = vld [vmem:[%s1739_s6] ss:$0 sm:$0xff] }
 0x1f8   :  { %v1303_v49 = vpop.eup %1302  ;;  %v584_v52 = vadd.f32 %v1145_v48, %v1566_v10  ;;  %v575_v54 = vpop.f32.mrb[31].mxu1 }
 0x1f9   :  { %v1305_v56 = vpop.eup %1304  ;;  %v576_v58 = vadd.f32 %v1566_v10, %v575_v54  ;;  %1182 = vmatprep.mubr.bf16.mxu0 %v1303_v49 }
 0x1fa   :  { %v658_v60 = vpack.c.bf16 %v584_v52, %v581_v50  ;;  %1183 = vmatmul.mubr.bf16.gmra.mrb[20].mxu0 %v1305_v56 }
 0x1fb   :  { %v657_v61 = vpack.c.bf16 %v576_v58, %v573_v57 }
 0x1fd   :  { %1310 = vtanh.bf16 %v657_v61  ;;  %v1148_v62 = vpop.f32.mrb[32].mxu1 }
 0x1fe   :  { %1312 = vtanh.bf16 %v658_v60  ;;  %v588_v63 = vpop.f32.mrb[33].mxu1  ;;  %v597_v36 = vadd.f32 %v1148_v62, %v1566_v10 }
 0x1ff   :  { %v1149_v0 = vpop.f32.mrb[34].mxu1  ;;  %v589_v51 = vadd.f32 %v1566_v10, %v588_v63 }
 0x200   :  { %v1307_v1 = vpop.eup %1306  ;;  %v600_v2 = vadd.f32 %v1149_v0, %v1566_v10  ;;  %v591_v4 = vpop.f32.mrb[35].mxu1 }
 0x201   :  { %v1309_v42 = vpop.eup %1308  ;;  %v592_v55 = vadd.f32 %v1566_v10, %v591_v4  ;;  %1186 = vmatprep.mubr.bf16.mxu0 %v1307_v1 }
 0x202   :  { %v660_v39 = vpack.c.bf16 %v600_v2, %v597_v36  ;;  %1187 = vmatmul.mubr.bf16.gmra.mrb[24].mxu0 %v1309_v42 }
 0x203   :  { %v659_v47 = vpack.c.bf16 %v592_v55, %v589_v51 }
 0x205   :  { %1314 = vtanh.bf16 %v659_v47  ;;  %v1152_v53 = vpop.f32.mrb[36].mxu1 }
 0x206   :  { %1316 = vtanh.bf16 %v660_v39  ;;  %v604_v5 = vpop.f32.mrb[37].mxu1  ;;  %v613_v6 = vadd.f32 %v1152_v53, %v1566_v10 }
 0x207   :  { %v1153_v59 = vpop.f32.mrb[38].mxu1  ;;  %v605_v11 = vadd.f32 %v1566_v10, %v604_v5 }
 0x208   :  { %v1311_v3 = vpop.eup %1310  ;;  %v616_v7 = vadd.f32 %v1153_v59, %v1566_v10  ;;  %v607_v8 = vpop.f32.mrb[39].mxu1 }
 0x209   :  { %v1313_v9 = vpop.eup %1312  ;;  %v608_v12 = vadd.f32 %v1566_v10, %v607_v8  ;;  %1190 = vmatprep.mubr.bf16.mxu0 %v1311_v3 }
 0x20a   :  { %v662_v13 = vpack.c.bf16 %v616_v7, %v613_v6  ;;  %1191 = vmatmul.mubr.bf16.gmra.mrb[28].mxu0 %v1313_v9 }
 0x20b   :  { %v661_v14 = vpack.c.bf16 %v608_v12, %v605_v11 }
 0x20d   :  { %1318 = vtanh.bf16 %v661_v14  ;;  %v1156_v15 = vpop.f32.mrb[40].mxu1 }
 0x20e   :  { %1320 = vtanh.bf16 %v662_v13  ;;  %v620_v16 = vpop.f32.mrb[41].mxu1  ;;  %v629_v19 = vadd.f32 %v1156_v15, %v1566_v10 }
 0x20f   :  { %v1157_v17 = vpop.f32.mrb[42].mxu1  ;;  %v621_v23 = vadd.f32 %v1566_v10, %v620_v16 }
 0x210   :  { %v1315_v18 = vpop.eup %1314  ;;  %v632_v20 = vadd.f32 %v1157_v17, %v1566_v10  ;;  %v623_v21 = vpop.f32.mrb[43].mxu1 }
 0x211   :  { %v1317_v22 = vpop.eup %1316  ;;  %v624_v24 = vadd.f32 %v1566_v10, %v623_v21  ;;  %1194 = vmatprep.mubr.bf16.mxu0 %v1315_v18 }
 0x212   :  { %v664_v25 = vpack.c.bf16 %v632_v20, %v629_v19  ;;  %1195 = vmatmul.mubr.bf16.gmra.mrb[32].mxu0 %v1317_v22 }
 0x213   :  { %v663_v26 = vpack.c.bf16 %v624_v24, %v621_v23 }
 0x215   :  { %1322 = vtanh.bf16 %v663_v26  ;;  %v1160_v27 = vpop.f32.mrb[44].mxu1 }
 0x216   :  { %1324 = vtanh.bf16 %v664_v25  ;;  %v636_v28 = vpop.f32.mrb[45].mxu1  ;;  %v645_v31 = vadd.f32 %v1160_v27, %v1566_v10 }
 0x217   :  { %v1161_v29 = vpop.f32.mrb[46].mxu1  ;;  %v637_v35 = vadd.f32 %v1566_v10, %v636_v28 }
 0x218   :  { %v1319_v30 = vpop.eup %1318  ;;  %v648_v32 = vadd.f32 %v1161_v29, %v1566_v10  ;;  %v639_v33 = vpop.f32.mrb[47].mxu1 }
 0x219   :  { %v1321_v34 = vpop.eup %1320  ;;  %v640_v37 = vadd.f32 %v1566_v10, %v639_v33  ;;  %1198 = vmatprep.mubr.bf16.mxu0 %v1319_v30 }
 0x21a   :  { %v666_v38 = vpack.c.bf16 %v648_v32, %v645_v31  ;;  %1199 = vmatmul.mubr.bf16.gmra.mrb[36].mxu0 %v1321_v34 }
 0x21b   :  { %v665_v40 = vpack.c.bf16 %v640_v37, %v637_v35 }
 0x21d   :  { %1326 = vtanh.bf16 %v665_v40 }
 0x21e   :  { %1328 = vtanh.bf16 %v666_v38 }
 0x220   :  { %v1323_v41 = vpop.eup %1322 }
 0x221   :  { %v1325_v43 = vpop.eup %1324  ;;  %1202 = vmatprep.mubr.bf16.mxu0 %v1323_v41 }
 0x222   :  { %1203 = vmatmul.mubr.bf16.gmra.mrb[40].mxu0 %v1325_v43 }
 0x228   :  { %v1327_v44 = vpop.eup %1326 }
 0x229   :  { %v1329_v45 = vpop.eup %1328  ;;  %1206 = vmatprep.mubr.bf16.mxu0 %v1327_v44 }
 0x22a   :  { %1207 = vmatmul.mubr.bf16.gmra.mrb[44].mxu0 %v1329_v45 }
 0x2c5   :  { %v1180_v10 = vpop.f32.mrb[16].mxu0 }
 0x2c6   :  { %v797_v48 = vadd.f32 %v1180_v10, %v1603_v46  ;;  %v788_v49 = vpop.f32.mrb[17].mxu0 }
 0x2c7   :  { %v789_v50 = vadd.f32 %v1603_v46, %v788_v49  ;;  %v1181_v52 = vpop.f32.mrb[18].mxu0 }
 0x2c8   :  { %917 = vst [vmem:[%s1740_s7 + $0x10] sm:$0xff] %v797_v48  ;;  %v800_v54 = vadd.f32 %v1181_v52, %v1603_v46  ;;  %v791_v56 = vpop.f32.mrb[19].mxu0 }
 0x2c9   :  { %915 = vst [vmem:[%s1740_s7] sm:$0xff] %v789_v50  ;;  %v792_v57 = vadd.f32 %v1603_v46, %v791_v56 }
 0x2ca   :  { %918 = vst [vmem:[%s1740_s7 + $0x18] sm:$0xff] %v800_v54 }
 0x2cb   :  { %916 = vst [vmem:[%s1740_s7 + $0x8] sm:$0xff] %v792_v57 }
 0x2cd   :  { %v1184_v58 = vpop.f32.mrb[20].mxu0 }
 0x2ce   :  { %v813_v60 = vadd.f32 %v1184_v58, %v1603_v46  ;;  %v804_v61 = vpop.f32.mrb[21].mxu0 }
 0x2cf   :  { %v805_v62 = vadd.f32 %v1603_v46, %v804_v61  ;;  %v1185_v63 = vpop.f32.mrb[22].mxu0 }
 0x2d0   :  { %921 = vst [vmem:[%s1740_s7 + $0x30] sm:$0xff] %v813_v60  ;;  %v816_v0 = vadd.f32 %v1185_v63, %v1603_v46  ;;  %v807_v1 = vpop.f32.mrb[23].mxu0 }
 0x2d1   :  { %919 = vst [vmem:[%s1740_s7 + $0x20] sm:$0xff] %v805_v62  ;;  %v808_v36 = vadd.f32 %v1603_v46, %v807_v1 }
 0x2d2   :  { %922 = vst [vmem:[%s1740_s7 + $0x38] sm:$0xff] %v816_v0 }
 0x2d3   :  { %920 = vst [vmem:[%s1740_s7 + $0x28] sm:$0xff] %v808_v36 }
 0x2d5   :  { %v1188_v2 = vpop.f32.mrb[24].mxu0 }
 0x2d6   :  { %v829_v4 = vadd.f32 %v1188_v2, %v1603_v46  ;;  %v820_v42 = vpop.f32.mrb[25].mxu0 }
 0x2d7   :  { %v821_v51 = vadd.f32 %v1603_v46, %v820_v42  ;;  %v1189_v55 = vpop.f32.mrb[26].mxu0 }
 0x2d8   :  { %925 = vst [vmem:[%s1740_s7 + $0x50] sm:$0xff] %v829_v4  ;;  %v832_v39 = vadd.f32 %v1189_v55, %v1603_v46  ;;  %v823_v47 = vpop.f32.mrb[27].mxu0 }
 0x2d9   :  { %923 = vst [vmem:[%s1740_s7 + $0x40] sm:$0xff] %v821_v51  ;;  %v824_v53 = vadd.f32 %v1603_v46, %v823_v47 }
 0x2da   :  { %926 = vst [vmem:[%s1740_s7 + $0x58] sm:$0xff] %v832_v39 }
 0x2db   :  { %924 = vst [vmem:[%s1740_s7 + $0x48] sm:$0xff] %v824_v53 }
 0x2dd   :  { %v1192_v5 = vpop.f32.mrb[28].mxu0 }
 0x2de   :  { %v845_v59 = vadd.f32 %v1192_v5, %v1603_v46  ;;  %v836_v3 = vpop.f32.mrb[29].mxu0 }
 0x2df   :  { %v837_v6 = vadd.f32 %v1603_v46, %v836_v3  ;;  %v1193_v7 = vpop.f32.mrb[30].mxu0 }
 0x2e0   :  { %929 = vst [vmem:[%s1740_s7 + $0x70] sm:$0xff] %v845_v59  ;;  %v848_v8 = vadd.f32 %v1193_v7, %v1603_v46  ;;  %v839_v9 = vpop.f32.mrb[31].mxu0 }
 0x2e1   :  { %927 = vst [vmem:[%s1740_s7 + $0x60] sm:$0xff] %v837_v6  ;;  %v840_v11 = vadd.f32 %v1603_v46, %v839_v9 }
 0x2e2   :  { %930 = vst [vmem:[%s1740_s7 + $0x78] sm:$0xff] %v848_v8 }
 0x2e3   :  { %928 = vst [vmem:[%s1740_s7 + $0x68] sm:$0xff] %v840_v11 }
 0x2e5   :  { %v1196_v12 = vpop.f32.mrb[32].mxu0 }
 0x2e6   :  { %v861_v13 = vadd.f32 %v1196_v12, %v1603_v46  ;;  %v852_v14 = vpop.f32.mrb[33].mxu0 }
 0x2e7   :  { %v853_v15 = vadd.f32 %v1603_v46, %v852_v14  ;;  %v1197_v16 = vpop.f32.mrb[34].mxu0 }
 0x2e8   :  { %933 = vst [vmem:[%s1740_s7 + $0x90] sm:$0xff] %v861_v13  ;;  %v864_v17 = vadd.f32 %v1197_v16, %v1603_v46  ;;  %v855_v18 = vpop.f32.mrb[35].mxu0 }
 0x2e9   :  { %931 = vst [vmem:[%s1740_s7 + $0x80] sm:$0xff] %v853_v15  ;;  %v856_v19 = vadd.f32 %v1603_v46, %v855_v18 }
 0x2ea   :  { %934 = vst [vmem:[%s1740_s7 + $0x98] sm:$0xff] %v864_v17 }
 0x2eb   :  { %932 = vst [vmem:[%s1740_s7 + $0x88] sm:$0xff] %v856_v19 }
 0x2ed   :  { %v1200_v20 = vpop.f32.mrb[36].mxu0 }
 0x2ee   :  { %v877_v21 = vadd.f32 %v1200_v20, %v1603_v46  ;;  %v868_v22 = vpop.f32.mrb[37].mxu0 }
 0x2ef   :  { %v869_v23 = vadd.f32 %v1603_v46, %v868_v22  ;;  %v1201_v24 = vpop.f32.mrb[38].mxu0 }
 0x2f0   :  { %937 = vst [vmem:[%s1740_s7 + $0xb0] sm:$0xff] %v877_v21  ;;  %v880_v25 = vadd.f32 %v1201_v24, %v1603_v46  ;;  %v871_v26 = vpop.f32.mrb[39].mxu0 }
 0x2f1   :  { %935 = vst [vmem:[%s1740_s7 + $0xa0] sm:$0xff] %v869_v23  ;;  %v872_v27 = vadd.f32 %v1603_v46, %v871_v26 }
 0x2f2   :  { %938 = vst [vmem:[%s1740_s7 + $0xb8] sm:$0xff] %v880_v25 }
 0x2f3   :  { %936 = vst [vmem:[%s1740_s7 + $0xa8] sm:$0xff] %v872_v27 }
 0x2f5   :  { %v1204_v28 = vpop.f32.mrb[40].mxu0 }
 0x2f6   :  { %v893_v29 = vadd.f32 %v1204_v28, %v1603_v46  ;;  %v884_v30 = vpop.f32.mrb[41].mxu0 }
 0x2f7   :  { %v885_v31 = vadd.f32 %v1603_v46, %v884_v30  ;;  %v1205_v32 = vpop.f32.mrb[42].mxu0 }
 0x2f8   :  { %941 = vst [vmem:[%s1740_s7 + $0xd0] sm:$0xff] %v893_v29  ;;  %v896_v33 = vadd.f32 %v1205_v32, %v1603_v46  ;;  %v887_v34 = vpop.f32.mrb[43].mxu0 }
 0x2f9   :  { %939 = vst [vmem:[%s1740_s7 + $0xc0] sm:$0xff] %v885_v31  ;;  %v888_v35 = vadd.f32 %v1603_v46, %v887_v34 }
 0x2fa   :  { %942 = vst [vmem:[%s1740_s7 + $0xd8] sm:$0xff] %v896_v33 }
 0x2fb   :  { %940 = vst [vmem:[%s1740_s7 + $0xc8] sm:$0xff] %v888_v35 }
 0x2fd   :  { %v1208_v37 = vpop.f32.mrb[44].mxu0 }
 0x2fe   :  { %v909_v38 = vadd.f32 %v1208_v37, %v1603_v46  ;;  %v900_v40 = vpop.f32.mrb[45].mxu0 }
 0x2ff   :  { %v901_v41 = vadd.f32 %v1603_v46, %v900_v40  ;;  %v1209_v43 = vpop.f32.mrb[46].mxu0 }
 0x300   :  { %945 = vst [vmem:[%s1740_s7 + $0xf0] sm:$0xff] %v909_v38  ;;  %v912_v44 = vadd.f32 %v1209_v43, %v1603_v46  ;;  %v903_v45 = vpop.f32.mrb[47].mxu0 }
 0x301   :  { %943 = vst [vmem:[%s1740_s7 + $0xe0] sm:$0xff] %v901_v41  ;;  %v904_v10 = vadd.f32 %v1603_v46, %v903_v45 }
 0x302   :  { %946 = vst [vmem:[%s1740_s7 + $0xf8] sm:$0xff] %v912_v44 }
 0x303   :  { %944 = vst [vmem:[%s1740_s7 + $0xe8] sm:$0xff] %v904_v10 }

</bundles_post_ra>
